<compile_context>
chip_gen: v7x
topology: tpu7x:2x2x1
jax: 0.10.0
libtpu: 0.0.40
codegen_flags: <defaults>
</compile_context>

<pallas_src>
import functools

import jax
import jax.numpy as jnp
from jax.experimental import pallas as pl
from jax.experimental.pallas import tpu as pltpu


_VMEM_LIMIT_BYTES = 32 * 1024 * 1024    # scoped-VMEM ceiling safe on v5e/v6e/v7x
_SEG_BLOCK_BUDGET = 4 * 1024 * 1024     # target bytes for the largest tiled input block
_TILED_STEP_BUDGET = 10 * 1024 * 1024   # all tiled input blocks per grid step (x2 buffers ~ 20 MiB)
_EW_BLOCK_BUDGET = 4 * 1024 * 1024      # standalone element-wise kernels


def _sublane_pack(dtype):
    """Sublane packing: 8 for >=4-byte dtypes, 16 for 2-byte, 32 for 1-byte."""
    isz = jnp.dtype(dtype).itemsize
    return max(8, 32 // max(1, min(isz, 4)))


# ----------------------------------------------------------------------------
# Fused kernel: seg CE (+ L1 on the same pixel grid) + labels CE + bbox MSE
# Grid: (batch  [parallel],  pixel tiles  [arbitrary, reduction])
# Outputs: per-sample partials, lane-dense (1, N*128) arrays with (1,128) blocks.
# ----------------------------------------------------------------------------

def _fused_kernel(hw_total, inv_seg, inv_lab, inv_bb, inv_img,
                  needs_mask, with_color, *refs):
    if with_color:
        (seg_ref, segtgt_ref, lab_ref, labtgt_ref, bbin_ref, bbtgt_ref,
         img_ref, imgtgt_ref,
         seg_out, lab_out, bb_out, l1_out,
         seg_acc, l1_acc) = refs
    else:
        (seg_ref, segtgt_ref, lab_ref, labtgt_ref, bbin_ref, bbtgt_ref,
         seg_out, lab_out, bb_out,
         seg_acc) = refs

    n = pl.program_id(0)
    k = pl.program_id(1)

    @pl.when(k == 0)
    def _():
        seg_acc[...] = jnp.zeros_like(seg_acc)
        if with_color:
            l1_acc[...] = jnp.zeros_like(l1_acc)

    C = seg_ref.shape[1]
    T = seg_ref.shape[2]

    if needs_mask:
        valid = (k * T + jax.lax.broadcasted_iota(jnp.int32, (1, T), 1)) < hw_total

    # --- segmentation cross-entropy on the (1, C, T) tile (classes on sublanes) ---
    blk = seg_ref[...].astype(jnp.float32)                       # (1, C, T)
    tgt = segtgt_ref[:, 0, :]                                    # (1, T) int32
    m = jnp.max(blk, axis=1, keepdims=True)                      # (1, 1, T)
    se = jnp.sum(jnp.exp(blk - m), axis=1)                       # (1, T)
    cls = jax.lax.broadcasted_iota(jnp.int32, (1, C, T), 1)
    picked = jnp.sum(jnp.where(cls == tgt[:, None, :], blk, 0.0), axis=1)
    ce = jnp.log(se) + m[:, 0, :] - picked                       # (1, T)
    if needs_mask:
        ce = jnp.where(valid, ce, 0.0)
    seg_acc[...] += ce                                           # pure VPU add per tile

    # --- L1 image loss on the same pixel tile ---
    if with_color:
        d = jnp.abs(img_ref[...].astype(jnp.float32)
                    - imgtgt_ref[...].astype(jnp.float32))       # (1, CI, T)
        if needs_mask:
            d = jnp.where(valid[:, None, :], d, 0.0)
        l1_acc[...] += d

    # --- finalize: one cross-lane reduce per sample + the tiny per-sample losses ---
    @pl.when(k == pl.num_programs(1) - 1)
    def _():
        seg_out[...] = jnp.full(seg_out.shape,
                                jnp.sum(seg_acc[...]) * inv_seg, jnp.float32)
        if with_color:
            l1_out[...] = jnp.full(l1_out.shape,
                                   jnp.sum(l1_acc[...]) * inv_img, jnp.float32)

        # labels cross-entropy, contribution of sample n only
        logits = lab_ref[...].astype(jnp.float32)                # (B, CL)
        lt = labtgt_ref[...]                                     # (B, 1) int32
        B, CL = logits.shape
        mm = jnp.max(logits, axis=-1, keepdims=True)
        lse = jnp.log(jnp.sum(jnp.exp(logits - mm), axis=-1, keepdims=True)) + mm
        cidx = jax.lax.broadcasted_iota(jnp.int32, (B, CL), 1)
        pk = jnp.sum(jnp.where(cidx == lt, logits, 0.0), axis=-1, keepdims=True)
        ce_rows = lse - pk                                       # (B, 1)
        rowsel = jax.lax.broadcasted_iota(jnp.int32, (B, 1), 0) == n
        lab_out[...] = jnp.full(lab_out.shape,
                                jnp.sum(jnp.where(rowsel, ce_rows, 0.0)) * inv_lab,
                                jnp.float32)

        # bbox MSE, contribution of sample n only
        db = bbin_ref[...].astype(jnp.float32) - bbtgt_ref[...].astype(jnp.float32)
        sse_rows = jnp.sum(db * db, axis=-1, keepdims=True)      # (B, 1)
        bb_out[...] = jnp.full(bb_out.shape,
                               jnp.sum(jnp.where(rowsel, sse_rows, 0.0)) * inv_bb,
                               jnp.float32)


def fused_losses(seg_logits, seg_targets, labels, label_targets,
                 bboxes_in, bboxes_tgt, img_in=None, img_tgt=None):
    """Returns (seg_ce_mean, labels_ce_mean, bbox_mse_mean[, img_l1_mean])."""
    with_color = img_in is not None
    N, C, H, W = seg_logits.shape
    HW = H * W
    seg3 = seg_logits.reshape(N, C, HW)                        # contiguous, no transpose
    tgt3 = seg_targets.reshape(N, 1, HW).astype(jnp.int32)
    lt2 = label_targets.astype(jnp.int32).reshape(-1, 1)

    seg_isz = jnp.dtype(seg3.dtype).itemsize
    ppb = C * seg_isz + 4                                      # logits + int32 targets / pixel
    if with_color:
        CI = img_in.shape[1]
        img3 = img_in.reshape(N, CI, HW)
        imgt3 = img_tgt.reshape(N, CI, HW)
        img_isz = jnp.dtype(img3.dtype).itemsize
        ppb += 2 * CI * img_isz

    # Pixel-tile size: ~4 MiB for the logits block, ~10 MiB of tiled inputs / step.
    if HW < 128:
        t = HW
    else:
        hw_floor = (HW // 128) * 128
        t = _SEG_BLOCK_BUDGET // (C * seg_isz)
        t = min(t, _TILED_STEP_BUDGET // ppb)
        t = (t // 128) * 128
        t = min(t, hw_floor)
        t = max(t, 128)
    needs_mask = (HW % t) != 0
    grid = (N, pl.cdiv(HW, t))

    inv_seg = 1.0 / float(N * HW)
    inv_lab = 1.0 / float(labels.shape[0])
    inv_bb = 1.0 / float(bboxes_in.size)
    inv_img = 1.0 / float(img_in.size) if with_color else 0.0

    inputs = [seg3, tgt3, labels, lt2, bboxes_in, bboxes_tgt]
    in_specs = [
        pl.BlockSpec((1, C, t), lambda n, k: (n, 0, k)),
        pl.BlockSpec((1, 1, t), lambda n, k: (n, 0, k)),
        pl.BlockSpec(labels.shape, lambda n, k: (0, 0)),
        pl.BlockSpec(lt2.shape, lambda n, k: (0, 0)),
        pl.BlockSpec(bboxes_in.shape, lambda n, k: (0, 0)),
        pl.BlockSpec(bboxes_tgt.shape, lambda n, k: (0, 0)),
    ]
    scratch = [pltpu.VMEM((1, t), jnp.float32)]
    n_out = 3
    if with_color:
        inputs += [img3, imgt3]
        in_specs += [pl.BlockSpec((1, CI, t), lambda n, k: (n, 0, k))] * 2
        scratch += [pltpu.VMEM((1, CI, t), jnp.float32)]
        n_out = 4

    part_shape = jax.ShapeDtypeStruct((1, N * 128), jnp.float32)
    out_shape = tuple([part_shape] * n_out)
    out_specs = tuple([pl.BlockSpec((1, 128), lambda n, k: (0, n))] * n_out)

    kernel = functools.partial(_fused_kernel, HW, inv_seg, inv_lab, inv_bb,
                               inv_img, needs_mask, with_color)
    outs = pl.pallas_call(
        kernel,
        out_shape=out_shape,
        grid=grid,
        in_specs=in_specs,
        out_specs=out_specs,
        scratch_shapes=scratch,
        compiler_params=pltpu.CompilerParams(
            dimension_semantics=("parallel", "arbitrary"),
            vmem_limit_bytes=_VMEM_LIMIT_BYTES),
    )(*inputs)

    def _collapse(p):
        return jnp.sum(p.reshape(N, 128)[:, 0])

    results = tuple(_collapse(p) for p in outs)
    return results  # (seg, labels, bbox[, l1])


# ----------------------------------------------------------------------------
# Standalone element-wise mean reductions (L1 / MSE) — used only when the flag
# combination does not hit the fused path.
# ----------------------------------------------------------------------------

def _ew_mean_kernel(op, limit, inv, mask_dim, a_ref, b_ref, o_ref, acc_ref):
    i = pl.program_id(0)

    @pl.when(i == 0)
    def _():
        acc_ref[...] = jnp.zeros_like(acc_ref)

    d = a_ref[...].astype(jnp.float32) - b_ref[...].astype(jnp.float32)
    v = jnp.abs(d) if op == "l1" else d * d
    if mask_dim is not None:
        blk = a_ref.shape[mask_dim]
        idx = i * blk + jax.lax.broadcasted_iota(jnp.int32, v.shape, mask_dim)
        v = jnp.where(idx < limit, v, 0.0)
    acc_ref[...] += v                                           # pure VPU add per tile

    @pl.when(i == pl.num_programs(0) - 1)
    def _():
        o_ref[0, 0] = jnp.sum(acc_ref[...]) * inv


def _elemwise_mean(op, a, b):
    assert a.shape == b.shape
    e = int(a.size)
    per_elem = jnp.dtype(a.dtype).itemsize + jnp.dtype(b.dtype).itemsize

    width = None
    for w_ in (8192, 4096, 2048, 1024, 512, 256, 128):
        if e % w_ == 0:
            width = w_
            break

    if width is not None:
        rows = e // width
        a2, b2 = a.reshape(rows, width), b.reshape(rows, width)
        pack = max(_sublane_pack(a.dtype), _sublane_pack(b.dtype))
        max_tr = max(pack, (_EW_BLOCK_BUDGET // (width * per_elem)) // pack * pack)
        if rows <= max_tr:
            tr, mask_dim = rows, None                 # small: single full-extent block
        else:
            tr = max_tr
            mask_dim = 0 if rows % tr != 0 else None  # masked trailing row-block
        block, limit = (tr, width), rows
        grid = (pl.cdiv(rows, tr),)
        imap = lambda i: (i, 0)
    else:
        # ragged element count: lane-dense (1, e) strip, tile along lanes
        a2, b2 = a.reshape(1, e), b.reshape(1, e)
        max_cols = max(128, (_EW_BLOCK_BUDGET // per_elem) // 128 * 128)
        if e <= max_cols:
            tcols, mask_dim = e, None
        else:
            tcols = max_cols
            mask_dim = 1 if e % tcols != 0 else None
        block, limit = (1, tcols), e
        grid = (pl.cdiv(e, tcols),)
        imap = lambda i: (0, i)

    kernel = functools.partial(_ew_mean_kernel, op, limit, 1.0 / float(e), mask_dim)
    out = pl.pallas_call(
        kernel,
        out_shape=jax.ShapeDtypeStruct((1, 1), jnp.float32),
        grid=grid,
        in_specs=[pl.BlockSpec(block, imap), pl.BlockSpec(block, imap)],
        out_specs=pl.BlockSpec((1, 1), lambda i: (0, 0)),
        scratch_shapes=[pltpu.VMEM(block, jnp.float32)],
        compiler_params=pltpu.CompilerParams(
            dimension_semantics=("arbitrary",),
            vmem_limit_bytes=_VMEM_LIMIT_BYTES),
    )(a2, b2)
    return out[0, 0]


def l1_mean(a, b):
    return _elemwise_mean("l1", a, b)


def mse_mean(a, b):
    return _elemwise_mean("mse", a, b)


# ----------------------------------------------------------------------------
# ColorLoss.forward
# ----------------------------------------------------------------------------

def color_loss(input_labels, input_segmentations, input_bboxes, input_img,
               target_img, target_labels, target_segmentations, target_bboxes,
               flag_labels=True, flag_segmentations=True, flag_bboxes=True,
               flag_color=True):
    """Pallas implementation of ColorLoss.forward (flags are static Python bools)."""
    zero = jnp.zeros((), jnp.float32)
    labels_loss = zero
    segmentations_loss = zero
    bboxes_loss = zero
    ab_loss = zero

    if flag_labels:
        # Fuse the L1 loss into the same pixel grid when the image shares (N, H, W)
        # with the segmentation map (always true for this module).
        fuse_color = (flag_color
                      and input_img.shape[0] == input_segmentations.shape[0]
                      and input_img.shape[2:] == input_segmentations.shape[2:])
        res = fused_losses(input_segmentations, target_segmentations,
                           input_labels, target_labels,
                           input_bboxes, target_bboxes,
                           input_img if fuse_color else None,
                           target_img if fuse_color else None)
        segmentations_loss, labels_loss, bbox_mse = res[0], res[1], res[2]
        if flag_bboxes:
            bboxes_loss = bbox_mse
        if flag_color:
            ab_loss = res[3] if fuse_color else l1_mean(input_img, target_img)
    else:
        if flag_bboxes:
            bboxes_loss = mse_mean(input_bboxes, target_bboxes)
        if flag_color:
            ab_loss = l1_mean(input_img, target_img)

    loss = (1.0 * labels_loss + 20.0 * segmentations_loss
            + 7e-05 * bboxes_loss * 2.0 + ab_loss)
    return loss, labels_loss, segmentations_loss, bboxes_loss, ab_loss


# ----------------------------------------------------------------------------
# Pure-JAX reference for sanity check
# ----------------------------------------------------------------------------

def _ce_ref(logits, targets):
    logits = logits.astype(jnp.float32)
    lse = jax.scipy.special.logsumexp(logits, axis=-1)
    picked = jnp.take_along_axis(logits, targets[:, None].astype(jnp.int32), axis=-1)[:, 0]
    return jnp.mean(lse - picked)


def _color_loss_ref(input_labels, input_segmentations, input_bboxes, input_img,
                    target_img, target_labels, target_segmentations, target_bboxes,
                    flag_labels=True, flag_segmentations=True, flag_bboxes=True,
                    flag_color=True):
    zero = jnp.zeros((), jnp.float32)
    if flag_labels:
        labels_loss = _ce_ref(input_labels, target_labels)
        N, C, H, W = input_segmentations.shape
        seg_logits = jnp.transpose(input_segmentations, (0, 2, 3, 1)).reshape(-1, C)
        seg_loss = _ce_ref(seg_logits, target_segmentations.reshape(-1))
    else:
        labels_loss, seg_loss = zero, zero
    bbox_loss = jnp.mean((input_bboxes - target_bboxes) ** 2) if flag_bboxes else zero
    ab_loss = jnp.mean(jnp.abs(input_img - target_img)) if flag_color else zero
    loss = labels_loss + 20.0 * seg_loss + 7e-05 * bbox_loss * 2.0 + ab_loss
    return loss, labels_loss, seg_loss, bbox_loss, ab_loss


# ----------------------------------------------------------------------------
# Main
# ----------------------------------------------------------------------------

if __name__ == "__main__":
    def make_inputs(key, n, num_cls, seg_cls, h, w):
        ks = jax.random.split(key, 8)
        input_labels = jax.random.normal(ks[0], (n, num_cls), jnp.float32)
        target_labels = jax.random.randint(ks[1], (n,), 0, num_cls, jnp.int32)
        input_seg = jax.random.normal(ks[2], (n, seg_cls, h, w), jnp.float32)
        target_seg = jax.random.randint(ks[3], (n, h, w), 0, seg_cls, jnp.int32)
        input_bboxes = jax.random.normal(ks[4], (n, 4), jnp.float32)
        target_bboxes = jax.random.normal(ks[5], (n, 4), jnp.float32)
        input_img = jax.random.normal(ks[6], (n, 2, h, w), jnp.float32)
        target_img = jax.random.normal(ks[7], (n, 2, h, w), jnp.float32)
        return (input_labels, input_seg, input_bboxes, input_img,
                target_img, target_labels, target_seg, target_bboxes)

    key = jax.random.PRNGKey(0)
    k1, k2 = jax.random.split(key)

    cases = [
        # aligned pixel count (HW % 128 == 0), default flags -> single fused launch
        (make_inputs(k1, 2, 10, 5, 16, 16), dict()),
        # ragged pixel count (HW = 144) -> masked trailing pixel tiles
        (make_inputs(k2, 2, 11, 7, 16, 9), dict()),
        # flags-off path -> standalone element-wise kernels
        (make_inputs(k1, 2, 10, 5, 16, 16),
         dict(flag_labels=False, flag_bboxes=True, flag_color=True)),
    ]

    for args, flags in cases:
        out = jax.block_until_ready(color_loss(*args, **flags))
        ref = _color_loss_ref(*args, **flags)
        for o, r in zip(out, ref):
            assert jnp.allclose(o, r, rtol=1e-4, atol=1e-4), (o, r, flags)

    print("KERNEL_OK")
</pallas_src>

<mosaic_0001>
module attributes {stable_mosaic.version = 11 : i64} {
  func.func @_fused_kernel(%arg0: i32, %arg1: i32, %arg2: memref<1x5x256xf32, #tpu.memory_space<vmem>>, %arg3: memref<1x1x256xi32, #tpu.memory_space<vmem>>, %arg4: memref<2x10xf32, #tpu.memory_space<vmem>>, %arg5: memref<2x1xi32, #tpu.memory_space<vmem>>, %arg6: memref<2x4xf32, #tpu.memory_space<vmem>>, %arg7: memref<2x4xf32, #tpu.memory_space<vmem>>, %arg8: memref<1x2x256xf32, #tpu.memory_space<vmem>>, %arg9: memref<1x2x256xf32, #tpu.memory_space<vmem>>, %arg10: memref<1x128xf32, #tpu.memory_space<vmem>>, %arg11: memref<1x128xf32, #tpu.memory_space<vmem>>, %arg12: memref<1x128xf32, #tpu.memory_space<vmem>>, %arg13: memref<1x128xf32, #tpu.memory_space<vmem>>, %arg14: memref<1x256xf32, #tpu.memory_space<vmem>>, %arg15: memref<1x2x256xf32, #tpu.memory_space<vmem>>) attributes {dimension_semantics = [#tpu.dimension_semantics<parallel>, #tpu.dimension_semantics<arbitrary>], iteration_bounds = array<i64: 2, 1>, scalar_prefetch = 0 : i64, scratch_operands = 2 : i64, tpu.core_type = #tpu.core_type<tc>, window_params = [{transform_indices = @transform_0, window_bounds = array<i64: 1, 5, 256>}, {transform_indices = @transform_1, window_bounds = array<i64: 1, 1, 256>}, {pipeline_mode = #tpu.pipeline_mode<synchronous>, transform_indices = @transform_2, window_bounds = array<i64: 2, 10>}, {pipeline_mode = #tpu.pipeline_mode<synchronous>, transform_indices = @transform_3, window_bounds = array<i64: 2, 1>}, {pipeline_mode = #tpu.pipeline_mode<synchronous>, transform_indices = @transform_4, window_bounds = array<i64: 2, 4>}, {pipeline_mode = #tpu.pipeline_mode<synchronous>, transform_indices = @transform_5, window_bounds = array<i64: 2, 4>}, {transform_indices = @transform_6, window_bounds = array<i64: 1, 2, 256>}, {transform_indices = @transform_7, window_bounds = array<i64: 1, 2, 256>}, {transform_indices = @transform_8, window_bounds = array<i64: 1, 128>}, {transform_indices = @transform_9, window_bounds = array<i64: 1, 128>}, {transform_indices = @transform_10, window_bounds = array<i64: 1, 128>}, {transform_indices = @transform_11, window_bounds = array<i64: 1, 128>}]} {
    %c0_i32 = arith.constant 0 : i32
    %0 = arith.cmpi eq, %arg1, %c0_i32 : i32
    %1 = arith.extui %0 : i1 to i32
    %c0_i32_0 = arith.constant 0 : i32
    %2 = arith.cmpi ne, %1, %c0_i32_0 : i32
    scf.if %2 {
      %cst_27 = arith.constant 0.000000e+00 : f32
      %36 = vector.broadcast %cst_27 : f32 to vector<1x256xf32>
      %c0_28 = arith.constant 0 : index
      %c0_29 = arith.constant 0 : index
      %37 = vector.load %arg14[%c0_28, %c0_29] : memref<1x256xf32, #tpu.memory_space<vmem>>, vector<1x256xf32>
      tpu.vector_store %arg14[%c0_28, %c0_29], %36 {strides = array<i32>} : memref<1x256xf32, #tpu.memory_space<vmem>>, vector<1x256xf32>,
      %cst_30 = arith.constant 0.000000e+00 : f32
      %38 = vector.broadcast %cst_30 : f32 to vector<1x2x256xf32>
      %c0_31 = arith.constant 0 : index
      %c0_32 = arith.constant 0 : index
      %c0_33 = arith.constant 0 : index
      %39 = vector.load %arg15[%c0_31, %c0_32, %c0_33] : memref<1x2x256xf32, #tpu.memory_space<vmem>>, vector<1x2x256xf32>
      tpu.vector_store %arg15[%c0_31, %c0_32, %c0_33], %38 {strides = array<i32>} : memref<1x2x256xf32, #tpu.memory_space<vmem>>, vector<1x2x256xf32>,
    } else {
    }
    %c0 = arith.constant 0 : index
    %c0_1 = arith.constant 0 : index
    %c0_2 = arith.constant 0 : index
    %3 = vector.load %arg2[%c0, %c0_1, %c0_2] : memref<1x5x256xf32, #tpu.memory_space<vmem>>, vector<1x5x256xf32>
    %c0_3 = arith.constant 0 : index
    %c0_4 = arith.constant 0 : index
    %c0_5 = arith.constant 0 : index
    %4 = vector.load %arg3[%c0_3, %c0_4, %c0_5] : memref<1x1x256xi32, #tpu.memory_space<vmem>>, vector<1x1x256xi32>
    %5 = vector.shape_cast %4 : vector<1x1x256xi32> to vector<1x256xi32>
    %cst = arith.constant dense<0xFF800000> : vector<1x256xf32>
    %6 = vector.multi_reduction <maximumf>, %3, %cst [1] : vector<1x5x256xf32> to vector<1x256xf32>
    %7 = vector.shape_cast %6 : vector<1x256xf32> to vector<1x1x256xf32>
    %8 = vector.broadcast %7 : vector<1x1x256xf32> to vector<1x5x256xf32>
    %9 = arith.subf %3, %8 : vector<1x5x256xf32>
    %10 = math.exp %9 : vector<1x5x256xf32>
    %cst_6 = arith.constant dense<0.000000e+00> : vector<1x256xf32>
    %11 = vector.multi_reduction <add>, %10, %cst_6 [1] : vector<1x5x256xf32> to vector<1x256xf32>
    %12 = tpu.iota {dimensions = array<i32: 1>} : vector<1x5x256xi32>
    %13 = vector.shape_cast %5 : vector<1x256xi32> to vector<1x1x256xi32>
    %14 = vector.broadcast %13 : vector<1x1x256xi32> to vector<1x5x256xi32>
    %15 = arith.cmpi eq, %12, %14 : vector<1x5x256xi32>
    %cst_7 = arith.constant 0.000000e+00 : f32
    %16 = vector.broadcast %cst_7 : f32 to vector<1x5x256xf32>
    %17 = arith.select %15, %3, %16 : vector<1x5x256xi1>, vector<1x5x256xf32>
    %cst_8 = arith.constant dense<0.000000e+00> : vector<1x256xf32>
    %18 = vector.multi_reduction <add>, %17, %cst_8 [1] : vector<1x5x256xf32> to vector<1x256xf32>
    %19 = math.log %11 : vector<1x256xf32>
    %20 = vector.shape_cast %7 : vector<1x1x256xf32> to vector<1x256xf32>
    %21 = arith.addf %19, %20 : vector<1x256xf32>
    %22 = arith.subf %21, %18 : vector<1x256xf32>
    %c0_9 = arith.constant 0 : index
    %c0_10 = arith.constant 0 : index
    %23 = vector.load %arg14[%c0_9, %c0_10] : memref<1x256xf32, #tpu.memory_space<vmem>>, vector<1x256xf32>
    %24 = arith.addf %23, %22 : vector<1x256xf32>
    %c0_11 = arith.constant 0 : index
    %c0_12 = arith.constant 0 : index
    %25 = vector.load %arg14[%c0_11, %c0_12] : memref<1x256xf32, #tpu.memory_space<vmem>>, vector<1x256xf32>
    tpu.vector_store %arg14[%c0_11, %c0_12], %24 {strides = array<i32>} : memref<1x256xf32, #tpu.memory_space<vmem>>, vector<1x256xf32>,
    %c0_13 = arith.constant 0 : index
    %c0_14 = arith.constant 0 : index
    %c0_15 = arith.constant 0 : index
    %26 = vector.load %arg8[%c0_13, %c0_14, %c0_15] : memref<1x2x256xf32, #tpu.memory_space<vmem>>, vector<1x2x256xf32>
    %c0_16 = arith.constant 0 : index
    %c0_17 = arith.constant 0 : index
    %c0_18 = arith.constant 0 : index
    %27 = vector.load %arg9[%c0_16, %c0_17, %c0_18] : memref<1x2x256xf32, #tpu.memory_space<vmem>>, vector<1x2x256xf32>
    %28 = arith.subf %26, %27 : vector<1x2x256xf32>
    %29 = math.absf %28 : vector<1x2x256xf32>
    %c0_19 = arith.constant 0 : index
    %c0_20 = arith.constant 0 : index
    %c0_21 = arith.constant 0 : index
    %30 = vector.load %arg15[%c0_19, %c0_20, %c0_21] : memref<1x2x256xf32, #tpu.memory_space<vmem>>, vector<1x2x256xf32>
    %31 = arith.addf %30, %29 : vector<1x2x256xf32>
    %c0_22 = arith.constant 0 : index
    %c0_23 = arith.constant 0 : index
    %c0_24 = arith.constant 0 : index
    %32 = vector.load %arg15[%c0_22, %c0_23, %c0_24] : memref<1x2x256xf32, #tpu.memory_space<vmem>>, vector<1x2x256xf32>
    tpu.vector_store %arg15[%c0_22, %c0_23, %c0_24], %31 {strides = array<i32>} : memref<1x2x256xf32, #tpu.memory_space<vmem>>, vector<1x2x256xf32>,
    %c0_i32_25 = arith.constant 0 : i32
    %33 = arith.cmpi eq, %arg1, %c0_i32_25 : i32
    %34 = arith.extui %33 : i1 to i32
    %c0_i32_26 = arith.constant 0 : i32
    %35 = arith.cmpi ne, %34, %c0_i32_26 : i32
    scf.if %35 {
      %c0_27 = arith.constant 0 : index
      %c0_28 = arith.constant 0 : index
      %36 = vector.load %arg14[%c0_27, %c0_28] : memref<1x256xf32, #tpu.memory_space<vmem>>, vector<1x256xf32>
      %37 = vector.shape_cast %36 : vector<1x256xf32> to vector<1x1x256xf32>
      %cst_29 = arith.constant dense<0.000000e+00> : vector<1xf32>
      %38 = vector.multi_reduction <add>, %37, %cst_29 [1, 2] : vector<1x1x256xf32> to vector<1xf32>
      %39 = vector.shape_cast %38 : vector<1xf32> to vector<1x1x1xf32>
      %40 = vector.extract %39[0, 0, 0] : f32 from vector<1x1x1xf32>
      %cst_30 = arith.constant 0.001953125 : f32
      %41 = arith.mulf %40, %cst_30 : f32
      %42 = vector.broadcast %41 : f32 to vector<1x128xf32>
      %c0_31 = arith.constant 0 : index
      %c0_32 = arith.constant 0 : index
      %43 = vector.load %arg10[%c0_31, %c0_32] : memref<1x128xf32, #tpu.memory_space<vmem>>, vector<1x128xf32>
      tpu.vector_store %arg10[%c0_31, %c0_32], %42 {strides = array<i32>} : memref<1x128xf32, #tpu.memory_space<vmem>>, vector<1x128xf32>,
      %c0_33 = arith.constant 0 : index
      %c0_34 = arith.constant 0 : index
      %c0_35 = arith.constant 0 : index
      %44 = vector.load %arg15[%c0_33, %c0_34, %c0_35] : memref<1x2x256xf32, #tpu.memory_space<vmem>>, vector<1x2x256xf32>
      %45 = vector.shape_cast %44 : vector<1x2x256xf32> to vector<1x1x2x256xf32>
      %cst_36 = arith.constant dense<0.000000e+00> : vector<1xf32>
      %46 = vector.multi_reduction <add>, %45, %cst_36 [1, 2, 3] : vector<1x1x2x256xf32> to vector<1xf32>
      %47 = vector.shape_cast %46 : vector<1xf32> to vector<1x1x1x1xf32>
      %48 = vector.extract %47[0, 0, 0, 0] : f32 from vector<1x1x1x1xf32>
      %cst_37 = arith.constant 9.765625E-4 : f32
      %49 = arith.mulf %48, %cst_37 : f32
      %50 = vector.broadcast %49 : f32 to vector<1x128xf32>
      %c0_38 = arith.constant 0 : index
      %c0_39 = arith.constant 0 : index
      %51 = vector.load %arg13[%c0_38, %c0_39] : memref<1x128xf32, #tpu.memory_space<vmem>>, vector<1x128xf32>
      tpu.vector_store %arg13[%c0_38, %c0_39], %50 {strides = array<i32>} : memref<1x128xf32, #tpu.memory_space<vmem>>, vector<1x128xf32>,
      %c0_40 = arith.constant 0 : index
      %c0_41 = arith.constant 0 : index
      %52 = vector.load %arg4[%c0_40, %c0_41] : memref<2x10xf32, #tpu.memory_space<vmem>>, vector<2x10xf32>
      %c0_42 = arith.constant 0 : index
      %c0_43 = arith.constant 0 : index
      %53 = vector.load %arg5[%c0_42, %c0_43] : memref<2x1xi32, #tpu.memory_space<vmem>>, vector<2x1xi32>
      %cst_44 = arith.constant dense<0xFF800000> : vector<2xf32>
      %54 = vector.multi_reduction <maximumf>, %52, %cst_44 [1] : vector<2x10xf32> to vector<2xf32>
      %55 = vector.shape_cast %54 : vector<2xf32> to vector<2x1xf32>
      %56 = vector.broadcast %55 : vector<2x1xf32> to vector<2x10xf32>
      %57 = arith.subf %52, %56 : vector<2x10xf32>
      %58 = math.exp %57 : vector<2x10xf32>
      %cst_45 = arith.constant dense<0.000000e+00> : vector<2xf32>
      %59 = vector.multi_reduction <add>, %58, %cst_45 [1] : vector<2x10xf32> to vector<2xf32>
      %60 = vector.shape_cast %59 : vector<2xf32> to vector<2x1xf32>
      %61 = math.log %60 : vector<2x1xf32>
      %62 = arith.addf %61, %55 : vector<2x1xf32>
      %63 = tpu.iota {dimensions = array<i32: 1>} : vector<2x10xi32>
      %64 = vector.broadcast %53 : vector<2x1xi32> to vector<2x10xi32>
      %65 = arith.cmpi eq, %63, %64 : vector<2x10xi32>
      %cst_46 = arith.constant 0.000000e+00 : f32
      %66 = vector.broadcast %cst_46 : f32 to vector<2x10xf32>
      %67 = arith.select %65, %52, %66 : vector<2x10xi1>, vector<2x10xf32>
      %cst_47 = arith.constant dense<0.000000e+00> : vector<2xf32>
      %68 = vector.multi_reduction <add>, %67, %cst_47 [1] : vector<2x10xf32> to vector<2xf32>
      %69 = vector.shape_cast %68 : vector<2xf32> to vector<2x1xf32>
      %70 = arith.subf %62, %69 : vector<2x1xf32>
      %71 = tpu.iota {dimensions = array<i32: 0>} : vector<2x1xi32>
      %72 = vector.broadcast %arg0 : i32 to vector<2x1xi32>
      %73 = arith.cmpi eq, %71, %72 : vector<2x1xi32>
      %cst_48 = arith.constant 0.000000e+00 : f32
      %74 = vector.broadcast %cst_48 : f32 to vector<2x1xf32>
      %75 = arith.select %73, %70, %74 : vector<2x1xi1>, vector<2x1xf32>
      %76 = vector.shape_cast %75 : vector<2x1xf32> to vector<1x2x1xf32>
      %cst_49 = arith.constant dense<0.000000e+00> : vector<1xf32>
      %77 = vector.multi_reduction <add>, %76, %cst_49 [1, 2] : vector<1x2x1xf32> to vector<1xf32>
      %78 = vector.shape_cast %77 : vector<1xf32> to vector<1x1x1xf32>
      %79 = vector.extract %78[0, 0, 0] : f32 from vector<1x1x1xf32>
      %cst_50 = arith.constant 5.000000e-01 : f32
      %80 = arith.mulf %79, %cst_50 : f32
      %81 = vector.broadcast %80 : f32 to vector<1x128xf32>
      %c0_51 = arith.constant 0 : index
      %c0_52 = arith.constant 0 : index
      %82 = vector.load %arg11[%c0_51, %c0_52] : memref<1x128xf32, #tpu.memory_space<vmem>>, vector<1x128xf32>
      tpu.vector_store %arg11[%c0_51, %c0_52], %81 {strides = array<i32>} : memref<1x128xf32, #tpu.memory_space<vmem>>, vector<1x128xf32>,
      %c0_53 = arith.constant 0 : index
      %c0_54 = arith.constant 0 : index
      %83 = vector.load %arg6[%c0_53, %c0_54] : memref<2x4xf32, #tpu.memory_space<vmem>>, vector<2x4xf32>
      %c0_55 = arith.constant 0 : index
      %c0_56 = arith.constant 0 : index
      %84 = vector.load %arg7[%c0_55, %c0_56] : memref<2x4xf32, #tpu.memory_space<vmem>>, vector<2x4xf32>
      %85 = arith.subf %83, %84 : vector<2x4xf32>
      %86 = arith.mulf %85, %85 : vector<2x4xf32>
      %cst_57 = arith.constant dense<0.000000e+00> : vector<2xf32>
      %87 = vector.multi_reduction <add>, %86, %cst_57 [1] : vector<2x4xf32> to vector<2xf32>
      %88 = vector.shape_cast %87 : vector<2xf32> to vector<2x1xf32>
      %cst_58 = arith.constant 0.000000e+00 : f32
      %89 = vector.broadcast %cst_58 : f32 to vector<2x1xf32>
      %90 = arith.select %73, %88, %89 : vector<2x1xi1>, vector<2x1xf32>
      %91 = vector.shape_cast %90 : vector<2x1xf32> to vector<1x2x1xf32>
      %cst_59 = arith.constant dense<0.000000e+00> : vector<1xf32>
      %92 = vector.multi_reduction <add>, %91, %cst_59 [1, 2] : vector<1x2x1xf32> to vector<1xf32>
      %93 = vector.shape_cast %92 : vector<1xf32> to vector<1x1x1xf32>
      %94 = vector.extract %93[0, 0, 0] : f32 from vector<1x1x1xf32>
      %cst_60 = arith.constant 1.250000e-01 : f32
      %95 = arith.mulf %94, %cst_60 : f32
      %96 = vector.broadcast %95 : f32 to vector<1x128xf32>
      %c0_61 = arith.constant 0 : index
      %c0_62 = arith.constant 0 : index
      %97 = vector.load %arg12[%c0_61, %c0_62] : memref<1x128xf32, #tpu.memory_space<vmem>>, vector<1x128xf32>
      tpu.vector_store %arg12[%c0_61, %c0_62], %96 {strides = array<i32>} : memref<1x128xf32, #tpu.memory_space<vmem>>, vector<1x128xf32>,
    } else {
    }
    return
  }
  func.func @transform_0(%arg0: i32, %arg1: i32) -> (i32, i32, i32) {
    %c0_i32 = arith.constant 0 : i32
    %c0_i32_0 = arith.constant 0 : i32
    return %arg0, %c0_i32, %arg1 : i32, i32, i32
  }
  func.func @transform_1(%arg0: i32, %arg1: i32) -> (i32, i32, i32) {
    %c0_i32 = arith.constant 0 : i32
    %c0_i32_0 = arith.constant 0 : i32
    return %arg0, %c0_i32, %arg1 : i32, i32, i32
  }
  func.func @transform_2(%arg0: i32, %arg1: i32) -> (i32, i32) {
    %c0_i32 = arith.constant 0 : i32
    %c0_i32_0 = arith.constant 0 : i32
    %c0_i32_1 = arith.constant 0 : i32
    return %c0_i32, %c0_i32_0 : i32, i32
  }
  func.func @transform_3(%arg0: i32, %arg1: i32) -> (i32, i32) {
    %c0_i32 = arith.constant 0 : i32
    %c0_i32_0 = arith.constant 0 : i32
    %c0_i32_1 = arith.constant 0 : i32
    return %c0_i32, %c0_i32_0 : i32, i32
  }
  func.func @transform_4(%arg0: i32, %arg1: i32) -> (i32, i32) {
    %c0_i32 = arith.constant 0 : i32
    %c0_i32_0 = arith.constant 0 : i32
    %c0_i32_1 = arith.constant 0 : i32
    return %c0_i32, %c0_i32_0 : i32, i32
  }
  func.func @transform_5(%arg0: i32, %arg1: i32) -> (i32, i32) {
    %c0_i32 = arith.constant 0 : i32
    %c0_i32_0 = arith.constant 0 : i32
    %c0_i32_1 = arith.constant 0 : i32
    return %c0_i32, %c0_i32_0 : i32, i32
  }
  func.func @transform_6(%arg0: i32, %arg1: i32) -> (i32, i32, i32) {
    %c0_i32 = arith.constant 0 : i32
    %c0_i32_0 = arith.constant 0 : i32
    return %arg0, %c0_i32, %arg1 : i32, i32, i32
  }
  func.func @transform_7(%arg0: i32, %arg1: i32) -> (i32, i32, i32) {
    %c0_i32 = arith.constant 0 : i32
    %c0_i32_0 = arith.constant 0 : i32
    return %arg0, %c0_i32, %arg1 : i32, i32, i32
  }
  func.func @transform_8(%arg0: i32, %arg1: i32) -> (i32, i32) {
    %c0_i32 = arith.constant 0 : i32
    %c0_i32_0 = arith.constant 0 : i32
    return %c0_i32, %arg0 : i32, i32
  }
  func.func @transform_9(%arg0: i32, %arg1: i32) -> (i32, i32) {
    %c0_i32 = arith.constant 0 : i32
    %c0_i32_0 = arith.constant 0 : i32
    return %c0_i32, %arg0 : i32, i32
  }
  func.func @transform_10(%arg0: i32, %arg1: i32) -> (i32, i32) {
    %c0_i32 = arith.constant 0 : i32
    %c0_i32_0 = arith.constant 0 : i32
    return %c0_i32, %arg0 : i32, i32
  }
  func.func @transform_11(%arg0: i32, %arg1: i32) -> (i32, i32) {
    %c0_i32 = arith.constant 0 : i32
    %c0_i32_0 = arith.constant 0 : i32
    return %c0_i32, %arg0 : i32, i32
  }
}

</mosaic_0001>

<bundles_post_ra>
// kernel: tpu_custom_call.1
= control target key start
LH: loop header
LB: loop body
LE: loop exit
PB: predicated region body
PF: predicated region fallthrough
CT: control target
= control target key end

     0   :  { %s1708_s0 = inlined_call_operand.vmem [shape: f32[2,5,256], index: 0, kind: input, shape index: {}]   ;;  %s1709_s1 = inlined_call_operand.vmem [shape: s32[2,1,256], index: 1, kind: input, shape index: {}]   ;;  %s1710_s2 = inlined_call_operand.vmem [shape: f32[2,10], index: 2, kind: input, shape index: {}]   ;;  %s1711_s3 = inlined_call_operand.vmem [shape: s32[2,1], index: 3, kind: input, shape index: {}]   ;;  %s1712_s4 = inlined_call_operand.vmem [shape: f32[2,4], index: 4, kind: input, shape index: {}]   ;;  %s1713_s5 = inlined_call_operand.vmem [shape: f32[2,4], index: 5, kind: input, shape index: {}]   ;;  %s1714_s6 = inlined_call_operand.vmem [shape: f32[2,2,256], index: 6, kind: input, shape index: {}]   ;;  %s1715_s7 = inlined_call_operand.vmem [shape: f32[2,2,256], index: 7, kind: input, shape index: {}]   ;;  %s1716_s8 = inlined_call_operand.hbm [shape: f32[1,256], index: 8, kind: output, shape index: {0}]   ;;  %s1717_s9 = inlined_call_operand.hbm [shape: f32[1,256], index: 9, kind: output, shape index: {1}]   ;;  %s1718_s10 = inlined_call_operand.hbm [shape: f32[1,256], index: 10, kind: output, shape index: {2}]   ;;  %s1719_s11 = inlined_call_operand.hbm [shape: f32[1,256], index: 11, kind: output, shape index: {3}]  }
   0x1   :  { %1724 = sst [smem:[#allocation14_spill]] %s1708_s0 }
   0x2   :  { %1725 = sst [smem:[#allocation15_spill]] %s1709_s1 }
   0x3   :  { %1726 = sst [smem:[#allocation16_spill]] %s1710_s2 }
   0x4   :  { %1727 = sst [smem:[#allocation17_spill]] %s1711_s3 }
   0x5   :  { %1728 = sst [smem:[#allocation18_spill]] %s1712_s4 }
   0x6   :  { %1729 = sst [smem:[#allocation19_spill]] %s1713_s5 }
   0x7   :  { %17 = vsyncpa [#allocation5], 0 }
   0x8   :  { %19 = vsyncpa [#allocation5 + $0x1], 0 }
   0x9   :  { %20 = vsyncpa [#allocation7], 0 }
   0xa   :  { %22 = vsyncpa [#allocation7 + $0x1], 0 }
   0xb   :  { %23 = vsyncpa [#allocation10], 0 }
   0xc   :  { %25 = vsyncpa [#allocation10 + $0x1], 0  ;;  %s1402_s17 = smov 0   ;;  %s1404_s18 = smov 0  }
   0xd   :  { %s1406_s19 = smov 0   ;;  %s1408_s20 = smov 0  }
   0xe   :  { %s1410_s21 = smov 0   ;;  %s1412_s22 = smov 0  }
   0xf LB: > { %s1721_s23 = sadd.s32 4294967295, %s1333_s22   ;;  %s1720_s24 = sadd.s32 4294967294, %s1333_s22   ;;  %s1333_s22 = sphi %s1412_s22, %s31_s22   ;;  %s1329_s21 = sphi %s1410_s21, %s1749_s21   ;;  %s1325_s20 = sphi %s1408_s20, %s1748_s20   ;;  %s1321_s19 = sphi %s1406_s19, %s1747_s19   ;;  %s1317_s18 = sphi %s1404_s18, %s1746_s18   ;;  %s1313_s17 = sphi %s1402_s17, %s1745_s17  }
  0x10   : > { %s43_s25 = sadd.s32 1, %s1329_s21  ;;  %s246_s26 = sadd.s32 1, %s1321_s19 }
  0x11   : > { %p45_p0 = scmp.ge.s32.totalorder %s43_s25, 2  ;;  %p256_p1 = scmp.ne.s32.totalorder %s1321_s19, %s1317_s18 }
  0x12   : > { %p257_p2 = scmp.eq.s32.totalorder %s1721_s23, 1  ;;  %p262_p3 = scmp.ne.s32.totalorder %s1317_s18, %s1313_s17 }
  0x13   : > { %s1751_s25 = smov (%p45_p0, %s43_s25), 0  ;;  %p263_p5 = scmp.eq.s32.totalorder %s1720_s24, 1 }
  0x14   : > { %p1444_p4 = por %p257_p2, %p256_p1  ;;  %s243_s28 = ssub.s32 %s1329_s21, %s1751_s25 }
  0x15   : > { %p1051_p6 = scmp.ge.s32.totalorder %s1333_s22, 1  ;;  %p244_p7 = scmp.eq.s32.totalorder %s243_s28, 0 }
  0x16   : > { %p1453_p8 = por %p263_p5, %p262_p3  ;;  %p422_p9 = scmp.lt.s32.totalorder %s1333_s22, 3 }
  0x17   : > { %s1459_s30 = scalar_select %p244_p7, %s1321_s19, %s246_s26  }
  0x18   : > { %p423_p10 = pnand %p1051_p6, %p422_p9 }
  0x19   : > { %s1732_s2 = sld [smem:[#allocation16_spill]] (!%p423_p10)  ;;  %vm719_vm0 = vcmask (!%p423_p10), 74752   ;;  %v1335_v2 = vmov (!%p423_p10), 0   ;;  %s1733_s3 = sld [smem:[#allocation17_spill]] (!%p423_p10)  ;;  %v546_v4 = vlaneseq (!%p423_p10)  ;;  %v1336_v5 = vmov (!%p423_p10), 0.0  }
  0x1a   : > { %426 = sbr.rel (%p423_p10) target bundleno = 602 (0x25a), region = 52  ;;  %1150 = vset.pattern.permute.xlu0 (!%p423_p10), %v1335_v2  ;;  %551 = vst [vmem:[#allocation3] sm:$0xf] (!%p423_p10), %v1336_v5  ;;  %p504_p11 = scmp.lt.s32.totalorder (!%p423_p10), %s1325_s20, 1  ;;  %vm555_vm2 = vcmask (!%p423_p10), 1044480   ;;  %vm764_vm6 = vcmask (!%p423_p10), 25600  }
  0x1b   : > { %vm1472_vm1 = vcmp.lt.s32.totalorder (!%p423_p10), %v546_v4, 256  ;;  %s1736_s0 = sld [smem:[#allocation14_spill]] (!%p423_p10)  ;;  %v1497_v35 = vshrl.u32 (!%p423_p10), %v546_v4, 7  ;;  %s1737_s1 = sld [smem:[#allocation15_spill]] (!%p423_p10)  ;;  %v733_v2 = vand.u32 (!%p423_p10), 127, %v546_v4  ;;  %vm673_vm7 = vcmask (!%p423_p10), 1040384  }
  0x1c   : > { %550 = vst.msk [vmem:[#allocation2] sm:$0x3] (!%p423_p10), %vm1472_vm1, %v1336_v5  ;;  %s1738_s4 = sld [smem:[#allocation18_spill]] (!%p423_p10)  ;;  %s1739_s5 = sld [smem:[#allocation19_spill]] (!%p423_p10)  ;;  %vm701_vm8 = vcmask (!%p423_p10), 1041408   ;;  %vm746_vm10 = vcmask (!%p423_p10), 1024  }
  0x1d   : > { %v594_v41 = vsub.s32 (!%p423_p10), 0, %v1497_v35  ;;  %v598_v42 = vsub.s32 (!%p423_p10), 1, %v1497_v35  ;;  %s1554_s15 = sshll.u32 (!%p423_p10), %s1325_s20, 4 }
  0x1f   : > { %v1464_v0 = vld [vmem:[%s1732_s2] sm:$0x3] (!%p423_p10) }
  0x20   : > { %v720_v1 = vsel (!%p423_p10), %vm719_vm0, %v1464_v0, -inf  ;;  %v718_v3 = vld [vmem:[%s1733_s3] sm:$0x3] (!%p423_p10) }
  0x21   : > { %721 = vmax.xlane.f32.xlu0 %v720_v1  ;;  %s1480_s16 = scalar_select %p504_p11, %s1325_s20, 1 }
  0x23   : > { %s1066_s26 = sshll.u32 %s1480_s16, 4  ;;  %s1054_s14 = sshll.u32 %s1480_s16, 1 }
  0x24   : > { %s511_s13 = scalar_lea.vmem %s1736_s0, %s1066_s26  ;;  %s520_s28 = scalar_lea.vmem %s1737_s1, %s1054_s14 }
  0x25   : > { %v552_v7 = vld [vmem:[%s511_s13] sm:$0x1f]  ;;  %v553_v8 = vld [vmem:[%s511_s13 + $0x8] sm:$0x1f]  ;;  %s1067_s26 = sshll.u32 %s1480_s16, 2  ;;  %s1560_s1 = scalar_lea.hbm %s1716_s8, %s1554_s15 }
  0x26   : > { %v556_v9 = vsel %vm555_vm2, %v552_v7, -inf  ;;  %v563_v10 = vsel %vm555_vm2, %v553_v8, -inf  ;;  %v554_v43 = vld [vmem:[%s520_s28] sm:$0x3]  ;;  %s530_s13 = scalar_lea.vmem %s1714_s6, %s1067_s26  ;;  %s540_s24 = scalar_lea.vmem %s1715_s7, %s1067_s26 }
  0x27   : > { %v557_v11 = vrot.slane %v556_v9, 4  ;;  %v564_v12 = vrot.slane %v563_v10, 4  ;;  %v595_v46 = vrot.slane %v554_v43, %v594_v41  ;;  %v599_v47 = vrot.slane %v554_v43, %v598_v42 }
  0x29   : > { %v558_v13 = vmax.f32 %v556_v9, %v557_v11  ;;  %v565_v14 = vmax.f32 %v563_v10, %v564_v12  ;;  %vm600_vm3 = vcmp.eq.s32.totalorder %v1497_v35, %v595_v46  ;;  %vm601_vm4 = vcmp.eq.s32.totalorder %v1497_v35, %v599_v47  ;;  %v760_v11 = vld [vmem:[%s1738_s4] sm:$0x3] }
  0x2a   : > { %v602_v49 = vsel %vm600_vm3, %v552_v7, 0.0  ;;  %v603_v50 = vsel %vm601_vm4, %v553_v8, 0.0  ;;  %v761_v12 = vld [vmem:[%s1739_s5] sm:$0x3] }
  0x2b   : > { %v559_v15 = vrot.slane %v558_v13, 2  ;;  %v566_v16 = vrot.slane %v565_v14, 2  ;;  %v604_v52 = vsel %vm555_vm2, %v602_v49, 0.0  ;;  %v611_v53 = vsel %vm555_vm2, %v603_v50, 0.0 }
  0x2c   : > { %v605_v55 = vrot.slane %v604_v52, 4  ;;  %v612_v56 = vrot.slane %v611_v53, 4 }
  0x2d   : > { %v560_v17 = vmax.f32 %v558_v13, %v559_v15  ;;  %v567_v18 = vmax.f32 %v565_v14, %v566_v16  ;;  %v1337_v16 = vmov 1966171168  }
  0x2e   : > { %v606_v58 = vadd.f32 %v605_v55, %v604_v52  ;;  %v613_v59 = vadd.f32 %v612_v56, %v611_v53  ;;  %v743_v56 = vstv %s1325_s20 }
  0x2f   : > { %v561_v19 = vrot.slane %v560_v17, 1  ;;  %v568_v20 = vrot.slane %v567_v18, 1  ;;  %vm744_vm9 = vcmp.eq.s32.totalorder %v1497_v35, %v743_v56 }
  0x30   : > { %v607_v60 = vrot.slane %v606_v58, 2  ;;  %v614_v61 = vrot.slane %v613_v59, 2 }
  0x31   : > { %v1488_v21 = vmax.f32 %v560_v17, %v561_v19  ;;  %v1490_v22 = vmax.f32 %v567_v18, %v568_v20  ;;  %v631_v17 = vunpack.c.l.s4 %v1337_v16  ;;  %v762_v19 = vsub.f32 %v760_v11, %v761_v12 }
  0x32   : > { %v608_v62 = vadd.f32 %v607_v60, %v606_v58  ;;  %v615_v63 = vadd.f32 %v614_v61, %v613_v59 }
  0x33   : > { %v570_v23 = vsub.f32 %v552_v7, %v1488_v21  ;;  %v571_v24 = vsub.f32 %v553_v8, %v1490_v22 }
  0x34   : > { %v609_v7 = vrot.slane %v608_v62, 1  ;;  %v616_v8 = vrot.slane %v615_v63, 1 }
  0x35   : > { %v572_v25 = vmul.f32 1.442695, %v570_v23  ;;  %v574_v26 = vmul.f32 1.442695, %v571_v24  ;;  %v632_v23 = vunpack.c.0.s8 %v631_v17 }
  0x36   : > { %v610_v13 = vadd.f32 %v609_v7, %v608_v62  ;;  %v617_v14 = vadd.f32 %v616_v8, %v615_v63 }
  0x37   : > { %735 = vperm.xlu0 %1150, %v718_v3   ;;  %1151 = vpow2.f32 %v572_v25 }
  0x38   : > { %1153 = vpow2.f32 %v574_v26 }
  0x41   : > { %v1152_v27 = vpop.eup %1151 }
  0x42   : > { %v1154_v28 = vpop.eup %1153  ;;  %v576_v29 = vsel %vm555_vm2, %v1152_v27, 0.0 }
  0x43   : > { %v577_v30 = vrot.slane %v576_v29, 4  ;;  %v583_v31 = vsel %vm555_vm2, %v1154_v28, 0.0  ;;  %v635_v28 = vsub.s32 %v632_v23, %v1497_v35 }
  0x44   : > { %v584_v32 = vrot.slane %v583_v31, 4 }
  0x45   : > { %v578_v33 = vadd.f32 %v577_v30, %v576_v29  ;;  %v763_v29 = vmul.f32 %v762_v19, %v762_v19 }
  0x46   : > { %v585_v34 = vadd.f32 %v584_v32, %v583_v31  ;;  %v651_v31 = vld [vmem:[%s530_s13] sm:$0xf] }
  0x47   : > { %v579_v36 = vrot.slane %v578_v33, 2  ;;  %v652_v32 = vld [vmem:[%s540_s24] sm:$0xf]  ;;  %s1547_s24 = sand.u32 1, %s1317_s18  }
  0x48   : > { %v586_v37 = vrot.slane %v585_v34, 2  ;;  %s484_s28 = scalar_lea.vmem [#allocation4], %s1547_s24  ;;  %s1722_s14 = scalar_lea.vmem [#allocation9], %s1547_s24 }
  0x49   : > { %v580_v38 = vadd.f32 %v579_v36, %v578_v33  ;;  %v653_v33 = vsub.f32 %v651_v31, %v652_v32  ;;  %s807_s2 = sshll.u32 %s484_s28, 4  ;;  %s808_s2 = int_to_ptr.vmem [resolvable:$true] %s807_s2 }
  0x4a   : > { %v587_v39 = vadd.f32 %v586_v37, %v585_v34  ;;  %v765_v34 = vsel %vm764_vm6, %v763_v29, 0.0 }
  0x4b   : > { %v581_v40 = vrot.slane %v580_v38, 1  ;;  %v654_v37 = vand.u32 2147483647, %v653_v33 }
  0x4c   : > { %v588_v44 = vrot.slane %v587_v39, 1 }
  0x4d   : > { %v582_v45 = vadd.f32 %v581_v40, %v580_v38  ;;  %v655_v38 = vld [vmem:[#allocation3] sm:$0xf] }
  0x4e   : > { %v589_v48 = vadd.f32 %v588_v44, %v587_v39  ;;  %v656_v39 = vadd.f32 %v655_v38, %v654_v37 }
  0x4f   : > { %1155 = vlog2.f32 %v582_v45 }
  0x50   : > { %1157 = vlog2.f32 %v589_v48  ;;  %657 = vst [vmem:[#allocation3] sm:$0xf] %v656_v39 }
  0x57   : > { %v1059_v47 = vld.sshfl [vmem:[#allocation3] sm:$0x33 pattern:$0x76325410] }
  0x58   : > { %v698_v49 = vcombine.high %v1059_v47, %v1059_v47  ;;  %v702_v6 = vsel %vm701_vm8, %v1059_v47, 0.0 }
  0x59   : > { %v1156_v1 = vpop.eup %1155 }
  0x5a   : > { %v1158_v3 = vpop.eup %1157  ;;  %v619_v9 = vmul.f32 0.6931472, %v1156_v1  ;;  %v703_v50 = vsel %vm701_vm8, %v698_v49, 0.0 }
  0x5b   : > { %v621_v10 = vmul.f32 0.6931472, %v1158_v3  ;;  %v704_v52 = vadd.f32 %v703_v50, %v702_v6 }
  0x5c   : > { %v622_v15 = vadd.f32 %v619_v9, %v1488_v21 }
  0x5d   : > { %v623_v4 = vadd.f32 %v621_v10, %v1490_v22 }
  0x5e   : > { %v624_v18 = vsub.f32 %v622_v15, %v610_v13 }
  0x5f   : > { %v625_v20 = vsub.f32 %v623_v4, %v617_v14 }
  0x61   : > { %v629_v27 = vcombine.low %v624_v18, %v625_v20 }
  0x63   : > { %v636_v22 = vrot.slane %v629_v27, %v635_v28 }
  0x65   : > { %v643_v30 = vrot.slane %v636_v22, %v635_v28 }
  0xae   : > { %v1511_v51 = vpop.xlane.xlu0 %721 }
  0xaf   : > { %v723_v54 = vsub.f32 %v1464_v0, %v1511_v51 }
  0xb1   : > { %v724_v57 = vmul.f32 1.442695, %v723_v54 }
  0xb3   : > { %1159 = vpow2.f32 %v724_v57 }
  0xb6   : > { %v736_v5 = vpop.permute.xlu0 %735 }
  0xb7   : > { %vm737_vm5 = vcmp.eq.s32.totalorder %v733_v2, %v736_v5 }
  0xb8   : > { %v738_v25 = vsel %vm737_vm5, %v1464_v0, 0.0  ;;  %v626_v0 = vld [vmem:[#allocation2] sm:$0x3] }
  0xb9   : > { %v739_v21 = vsel %vm719_vm0, %v738_v25, 0.0  ;;  %v645_v36 = vadd.f32 %v643_v30, %v626_v0 }
  0xbb   : > { %650 = vst.msk [vmem:[#allocation2] sm:$0x3] %vm1472_vm1, %v645_v36 }
  0xbd   : > { %v1160_v24 = vpop.eup %1159 }
  0xbe   : > { %v726_v26 = vsel %vm719_vm0, %v1160_v24, 0.0 }
  0xbf   : > { %727 = vadd.xlane.f32.xlu1 %v726_v26 }
  0xc2   : > { %v661_v40 = vld [vmem:[#allocation2] sm:$0x3] }
  0xc3   : > { %740 = vadd.xlane.f32.xlu1 %v739_v21  ;;  %v666_v43 = vrot.slane %v661_v40, %v594_v41  ;;  %v670_v44 = vrot.slane %v661_v40, %v598_v42 }
  0xc5   : > { %v674_v45 = vsel %vm673_vm7, %v666_v43, 0.0  ;;  %v675_v46 = vsel %vm673_vm7, %v670_v44, 0.0 }
  0xc6   : > { %v676_v48 = vadd.f32 %v675_v46, %v674_v45 }
  0xc7   : > { %766 = vadd.xlane.f32.xlu1 %v765_v34 }
  0xcb   : > { %677 = vadd.xlane.f32.xlu1 %v676_v48 }
  0xcf   : > { %705 = vadd.xlane.f32.xlu1 %v704_v52 }
 0x14c   : > { %v728_v53 = vpop.xlane.xlu1 %727 }
 0x14d   : > { %1161 = vlog2.f32 %v728_v53 }
 0x150   : > { %v741_v41 = vpop.xlane.xlu1 %740 }
 0x154   : > { %v767_v57 = vpop.xlane.xlu1 %766 }
 0x155   : > { %v768_v60 = vsel %vm744_vm9, %v767_v57, 0.0 }
 0x156   : > { %v769_v63 = vsel %vm746_vm10, %v768_v60, 0.0 }
 0x157   : > { %v1162_v54 = vpop.eup %1161 }
 0x158   : > { %v730_v55 = vmul.f32 0.6931472, %v1162_v54  ;;  %v678_v62 = vpop.xlane.xlu1 %677 }
 0x159   : > { %v679_v1 = vrot.slane %v678_v62, 4 }
 0x15a   : > { %v731_v42 = vadd.f32 %v730_v55, %v1511_v51 }
 0x15b   : > { %v680_v2 = vadd.f32 %v679_v1, %v678_v62 }
 0x15c   : > { %v742_v58 = vsub.f32 %v731_v42, %v741_v41  ;;  %v706_v3 = vpop.xlane.xlu1 %705 }
 0x15d   : > { %v681_v5 = vrot.slane %v680_v2, 2  ;;  %v707_v7 = vrot.slane %v706_v3, 4 }
 0x15e   : > { %v745_v59 = vsel %vm744_vm9, %v742_v58, 0.0 }
 0x15f   : > { %v747_v61 = vsel %vm746_vm10, %v745_v59, 0.0  ;;  %v708_v8 = vadd.f32 %v707_v7, %v706_v3  ;;  %v682_v51 = vadd.f32 %v681_v5, %v680_v2 }
 0x160   : > { %748 = vadd.xlane.f32.xlu1 %v747_v61 }
 0x161   : > { %v709_v9 = vrot.slane %v708_v8, 2  ;;  %v683_v35 = vrot.slane %v682_v51, 1 }
 0x163   : > { %v684_v10 = vadd.f32 %v683_v35, %v682_v51  ;;  %v710_v11 = vadd.f32 %v709_v9, %v708_v8 }
 0x164   : > { %770 = vadd.xlane.f32.xlu1 %v769_v63 }
 0x165   : > { %1069 = vpush %v684_v10  ;;  %v711_v12 = vrot.slane %v710_v11, 1 }
 0x167   : > { %v712_v13 = vadd.f32 %v711_v12, %v710_v11 }
 0x169   : > { %1071 = vpush %v712_v13 }
 0x196   : > { %s1070_s16 = spop %1069 }
 0x197   : > { %s686_s26 = smul.f32 0.001953125, %s1070_s16  ;;  %s783_s16 = scalar_lea.sflag [#allocation5], %s1547_s24 }
 0x199   : > { %v687_v14 = vstv %s686_s26  ;;  %s1163_s26 = scalar_lea.vmem %s808_s2, 16 }
 0x19a   : > { %688 = vst [vmem:[%s484_s28] sm:$0x1] %v687_v14  ;;  %s1072_s12 = spop %1071  ;;  %p1164_p12 = scmp.ne.s32.totalorder %s808_s2, %s1163_s26 }
 0x19b   : > { %s714_s13 = smul.f32 0.0009765625, %s1072_s12  ;;  %s1338_s12 = smov [#allocation4]  }
 0x19c   : > { %p1165_p13 = pnand %p1164_p12, %p1444_p4 }
 0x19d   : > { %v715_v15 = vstv %s714_s13  ;;  %s1167_s13 = sshll.u32 %s1338_s12, 4  ;;  %s1168_s13 = int_to_ptr.vmem [resolvable:$false] %s1167_s13 }
 0x19e   : > { %716 = vst [vmem:[%s1722_s14] sm:$0x1] %v715_v15  ;;  %p1166_p0 = pneg %p1165_p13  ;;  %s1169_s14 = scalar_lea.vmem %s1168_s13, 32 }
 0x19f   : > { %p1170_p1 = scmp.lt.s32.totalorder %s808_s2, %s1168_s13  ;;  %p1171_p2 = scmp.lt.s32.totalorder %s1169_s14, %s1163_s26 }
 0x1a1   : > { %p1172_p3 = por %p1171_p2, %p1170_p1 }
 0x1a3   : > { %p1173_p5 = pnand %p1172_p3, %p1166_p0 }
 0x1a5   : > { %1176 = shalt.err (!%p1173_p5)
}
 0x1a6   : > { %s1177_s0 = scalar_lea.hbm %s1560_s1, 16  ;;  %s1181_s28 = scalar_lea.hbm %s1716_s8, 32 }
 0x1a7   : > { %p1178_p6 = scmp.ne.s32.totalorder %s1560_s1, %s1177_s0  ;;  %p1182_p10 = scmp.lt.u32.totalorder %s1560_s1, %s1716_s8 }
 0x1a8   : > { %p1183_p11 = scmp.lt.u32.totalorder %s1181_s28, %s1177_s0  ;;  %p1185_p13 = scmp.lt.u32.totalorder %s1177_s0, %s1560_s1 }
 0x1a9   : > { %p1179_p7 = pnand %p1178_p6, %p1444_p4 }
 0x1aa   : > { %p1184_p12 = por %p1183_p11, %p1182_p10 }
 0x1ab   : > { %p1180_p9 = pneg %p1179_p7 }
 0x1ac   : > { %p1186_p0 = por %p1185_p13, %p1184_p12 }
 0x1ae   : > { %p1187_p1 = pnand %p1186_p0, %p1180_p9 }
 0x1b0   : > { %1190 = shalt.err (!%p1187_p1)
}
 0x1b1   : > { %1077 = dma.vmem_to_hbm [thread:$0]  (%p1444_p4), %s808_s2, 16, %s1560_s1, %s783_s16  }
 0x1b2   : > { %s1584_s20 = scalar_lea.hbm %s1719_s11, %s1554_s15  ;;  %s1740_s23 = scalar_lea.vmem [#allocation9], %s1547_s24 }
 0x1b3   : > { %s846_s28 = sshll.u32 %s1740_s23, 4  ;;  %s795_s0 = scalar_lea.sflag [#allocation10], %s1547_s24  ;;  %s847_s28 = int_to_ptr.vmem [resolvable:$true] %s846_s28 }
 0x1b4   : > { %s1191_s12 = scalar_lea.vmem %s847_s28, 16  ;;  %s1339_s13 = smov [#allocation9]  }
 0x1b5   : > { %p1192_p2 = scmp.ne.s32.totalorder %s847_s28, %s1191_s12  ;;  %s1195_s3 = sshll.u32 %s1339_s13, 4  ;;  %s1196_s3 = int_to_ptr.vmem [resolvable:$false] %s1195_s3 }
 0x1b6   : > { %s1197_s4 = scalar_lea.vmem %s1196_s3, 32  ;;  %p1198_p6 = scmp.lt.s32.totalorder %s847_s28, %s1196_s3 }
 0x1b7   : > { %p1193_p3 = pnand %p1192_p2, %p1444_p4  ;;  %p1199_p7 = scmp.lt.s32.totalorder %s1197_s4, %s1191_s12 }
 0x1b9   : > { %p1194_p5 = pneg %p1193_p3  ;;  %p1200_p9 = por %p1199_p7, %p1198_p6 }
 0x1bb   : > { %p1201_p10 = pnand %p1200_p9, %p1194_p5 }
 0x1bd   : > { %1204 = shalt.err (!%p1201_p10)
}
 0x1be   : > { %s1205_s1 = scalar_lea.hbm %s1584_s20, 16  ;;  %s1209_s14 = scalar_lea.hbm %s1719_s11, 32 }
 0x1bf   : > { %p1206_p11 = scmp.ne.s32.totalorder %s1584_s20, %s1205_s1  ;;  %p1210_p0 = scmp.lt.u32.totalorder %s1584_s20, %s1719_s11 }
 0x1c0   : > { %p1211_p1 = scmp.lt.u32.totalorder %s1209_s14, %s1205_s1  ;;  %p1213_p3 = scmp.lt.u32.totalorder %s1205_s1, %s1584_s20 }
 0x1c1   : > { %p1207_p12 = pnand %p1206_p11, %p1444_p4 }
 0x1c2   : > { %p1212_p2 = por %p1211_p1, %p1210_p0 }
 0x1c3   : > { %p1208_p13 = pneg %p1207_p12 }
 0x1c4   : > { %p1214_p5 = por %p1213_p3, %p1212_p2 }
 0x1c6   : > { %p1215_p6 = pnand %p1214_p5, %p1208_p13 }
 0x1c8   : > { %1218 = shalt.err (!%p1215_p6)
}
 0x1c9   : > { %1080 = dma.vmem_to_hbm [thread:$0]  (%p1444_p4), %s847_s28, 16, %s1584_s20, %s795_s0  }
 0x1ca   : > { %s1741_s4 = sadd.s32 4294967295, %s1333_s22   ;;  %s490_s28 = scalar_lea.vmem [#allocation6], %s1547_s24 }
 0x1cb   : > { %s1608_s20 = sand.u32 1, %s1741_s4   ;;  %s820_s0 = sshll.u32 %s490_s28, 4  ;;  %s1620_s0 = int_to_ptr.vmem [resolvable:$true] %s820_s0 }
 0x1cc   : > { %s1723_s13 = scalar_lea.vmem [#allocation8], %s1547_s24  ;;  %s1618_s14 = scalar_lea.hbm %s1717_s9, %s1554_s15 }
 0x1cd   : > { %s833_s1 = sshll.u32 %s1723_s13, 4  ;;  %s787_s2 = scalar_lea.sflag [#allocation7], %s1608_s20  ;;  %s1624_s1 = int_to_ptr.vmem [resolvable:$true] %s833_s1 }
 0x1ce   : > { %s1219_s16 = scalar_lea.vmem %s1620_s0, 16  ;;  %s1340_s13 = smov [#allocation6]  }
 0x1cf   : > { %p1220_p7 = scmp.ne.s32.totalorder %s1620_s0, %s1219_s16  ;;  %s1223_s5 = sshll.u32 %s1340_s13, 4  ;;  %s1224_s5 = int_to_ptr.vmem [resolvable:$false] %s1223_s5 }
 0x1d0   : > { %p1226_p11 = scmp.lt.s32.totalorder %s1620_s0, %s1224_s5 }
 0x1d1   : > { %p1221_p9 = pnand %p1220_p7, %p1444_p4 }
 0x1d3   : > { %p1222_p10 = pneg %p1221_p9 }
 0x1ed   : > { %v749_v4 = vpop.xlane.xlu1 %748 }
 0x1ee   : > { %v750_v16 = vrot.slane %v749_v4, 4 }
 0x1f0   : > { %v751_v17 = vadd.f32 %v750_v16, %v749_v4 }
 0x1f1   : > { %v771_v18 = vpop.xlane.xlu1 %770 }
 0x1f2   : > { %v752_v19 = vrot.slane %v751_v17, 2  ;;  %v772_v20 = vrot.slane %v771_v18, 4 }
 0x1f4   : > { %v773_v23 = vadd.f32 %v772_v20, %v771_v18  ;;  %v753_v24 = vadd.f32 %v752_v19, %v751_v17 }
 0x1f6   : > { %v774_v25 = vrot.slane %v773_v23, 2  ;;  %v754_v26 = vrot.slane %v753_v24, 1 }
 0x1f8   : > { %v775_v27 = vadd.f32 %v774_v25, %v773_v23  ;;  %v755_v28 = vadd.f32 %v754_v26, %v753_v24 }
 0x1fa   : > { %1073 = vpush %v755_v28  ;;  %v776_v21 = vrot.slane %v775_v27, 1 }
 0x1fc   : > { %v777_v29 = vadd.f32 %v776_v21, %v775_v27 }
 0x1fe   : > { %1075 = vpush %v777_v29 }
 0x22b   : > { %s1074_s23 = spop %1073 }
 0x22c   : > { %s757_s12 = smul.f32 0.5, %s1074_s23 }
 0x22e   : > { %v758_v22 = vstv %s757_s12  ;;  %s1631_s12 = scalar_lea.hbm %s1718_s10, %s1554_s15 }
 0x22f   : > { %759 = vst [vmem:[%s490_s28] sm:$0x1] %v758_v22  ;;  %s1622_s26 = spop %1075  ;;  %s1225_s28 = scalar_lea.vmem %s1224_s5, 32 }
 0x230   : > { %p1227_p12 = scmp.lt.s32.totalorder %s1225_s28, %s1219_s16 }
 0x232   : > { %p1228_p13 = por %p1227_p12, %p1226_p11 }
 0x234   : > { %p1229_p0 = pnand %p1228_p13, %p1222_p10 }
 0x236   : > { %1232 = shalt.err (!%p1229_p0)
}
 0x237   : > { %s1233_s15 = scalar_lea.hbm %s1618_s14, 16  ;;  %s1237_s13 = scalar_lea.hbm %s1717_s9, 32 }
 0x238   : > { %p1234_p1 = scmp.ne.s32.totalorder %s1618_s14, %s1233_s15  ;;  %p1238_p5 = scmp.lt.u32.totalorder %s1618_s14, %s1717_s9 }
 0x239   : > { %p1239_p6 = scmp.lt.u32.totalorder %s1237_s13, %s1233_s15  ;;  %p1241_p9 = scmp.lt.u32.totalorder %s1233_s15, %s1618_s14 }
 0x23a   : > { %p1235_p2 = pnand %p1234_p1, %p1444_p4 }
 0x23b   : > { %p1240_p7 = por %p1239_p6, %p1238_p5 }
 0x23c   : > { %p1236_p3 = pneg %p1235_p2 }
 0x23d   : > { %p1242_p10 = por %p1241_p9, %p1240_p7 }
 0x23f   : > { %p1243_p11 = pnand %p1242_p10, %p1236_p3 }
 0x241   : > { %1246 = shalt.err (!%p1243_p11)
}
 0x242   : > { %1078 = dma.vmem_to_hbm [thread:$0]  (%p1444_p4), %s1620_s0, 16, %s1618_s14, %s787_s2  }
 0x243   : > { %s1742_s3 = smul.f32 0.125, %s1622_s26  ;;  %s1743_s16 = scalar_lea.vmem [#allocation8], %s1547_s24 }
 0x244   : > { %s1247_s28 = scalar_lea.vmem %s1624_s1, 16  ;;  %s1341_s15 = smov [#allocation8]  }
 0x245   : > { %v780_v0 = vstv %s1742_s3  ;;  %p1248_p12 = scmp.ne.s32.totalorder %s1624_s1, %s1247_s28  ;;  %s1251_s4 = sshll.u32 %s1341_s15, 4  ;;  %s1252_s4 = int_to_ptr.vmem [resolvable:$false] %s1251_s4 }
 0x246   : > { %781 = vst [vmem:[%s1743_s16] sm:$0x1] %v780_v0  ;;  %s1253_s23 = scalar_lea.vmem %s1252_s4, 32  ;;  %p1254_p1 = scmp.lt.s32.totalorder %s1624_s1, %s1252_s4 }
 0x247   : > { %p1249_p13 = pnand %p1248_p12, %p1444_p4  ;;  %p1255_p2 = scmp.lt.s32.totalorder %s1253_s23, %s1247_s28 }
 0x249   : > { %p1250_p0 = pneg %p1249_p13  ;;  %p1256_p3 = por %p1255_p2, %p1254_p1 }
 0x24b   : > { %p1257_p5 = pnand %p1256_p3, %p1250_p0 }
 0x24d   : > { %1260 = shalt.err (!%p1257_p5)
}
 0x24e   : > { %s1261_s24 = scalar_lea.hbm %s1631_s12, 16  ;;  %s1265_s26 = scalar_lea.hbm %s1718_s10, 32 }
 0x24f   : > { %p1262_p6 = scmp.ne.s32.totalorder %s1631_s12, %s1261_s24  ;;  %p1266_p10 = scmp.lt.u32.totalorder %s1631_s12, %s1718_s10 }
 0x250   : > { %p1267_p11 = scmp.lt.u32.totalorder %s1265_s26, %s1261_s24  ;;  %p1269_p13 = scmp.lt.u32.totalorder %s1261_s24, %s1631_s12 }
 0x251   : > { %p1263_p7 = pnand %p1262_p6, %p1444_p4 }
 0x252   : > { %p1268_p12 = por %p1267_p11, %p1266_p10 }
 0x253   : > { %p1264_p9 = pneg %p1263_p7 }
 0x254   : > { %p1270_p0 = por %p1269_p13, %p1268_p12 }
 0x256   : > { %p1271_p1 = pnand %p1270_p0, %p1264_p9 }
 0x258   : > { %1274 = shalt.err (!%p1271_p1)
}
 0x259   : > { %1079 = dma.vmem_to_hbm [thread:$0]  (%p1444_p4), %s1624_s1, 16, %s1631_s12, %s787_s2  }
 0x25a PF: > { %p1098_p2 = scmp.ge.s32.totalorder %s1333_s22, 2  ;;  %s858_s3 = sand.u32 1, %s1313_s17  }
 0x25b   : > { %s859_s16 = scalar_lea.sflag [#allocation5], %s858_s3 }
 0x25c   : > { %p1086_p3 = pnand %p1098_p2, %p1453_p8 }
 0x25e   : > { %1300 = dma.done.wait (!%p1086_p3), %s859_s16, 16  }
 0x25f   : > { %1302 = vsyncadd (!%p1086_p3), %s859_s16, 4294967280  ;;  %s1744_s28 = sadd.s32 4294967294, %s1333_s22  }
 0x260   : > { %s866_s15 = sand.u32 1, %s1744_s28  }
 0x261   : > { %s867_s27 = scalar_lea.sflag [#allocation7], %s866_s15 }
 0x262   : > { %1304 = dma.done.wait (!%p1086_p3), %s867_s27, 32  }
 0x263   : > { %1306 = vsyncadd (!%p1086_p3), %s867_s27, 4294967264  ;;  %s883_s20 = scalar_lea.sflag [#allocation10], %s858_s3 }
 0x264   : > { %1308 = dma.done.wait (!%p1086_p3), %s883_s20, 16  }
 0x265   : > { %1310 = vsyncadd (!%p1086_p3), %s883_s20, 4294967280  ;;  %s31_s22 = sadd.s32 1, %s1333_s22   ;;  %s1745_s17 = smov %s1317_s18 }
 0x266   : > { %p28_p4 = scmp.ge.s32.totalorder %s31_s22, 4   ;;  %s1746_s18 = smov %s1321_s19 }
 0x267   : > { %s1747_s19 = smov %s1459_s30  ;;  %s1748_s20 = smov %s1329_s21 }
 0x268   : > { %s1749_s21 = smov %s1751_s25  ;;  %30 = sbr.rel (!%p28_p4) target bundleno = 15 (0xf), region = 153 }
 0x26f   :  { %887 = vsyncpa [#allocation5], 1 }
 0x270   :  { %889 = vsyncpa [#allocation5 + $0x1], 1 }
 0x271   :  { %890 = vsyncpa [#allocation7], 1 }
 0x272   :  { %892 = vsyncpa [#allocation7 + $0x1], 1 }
 0x273   :  { %893 = vsyncpa [#allocation10], 1 }
 0x274   :  { %895 = vsyncpa [#allocation10 + $0x1], 1 }

</bundles_post_ra>
